<compile_context>
chip_gen: v7x
topology: tpu7x:2x2x1
jax: 0.10.0
libtpu: 0.0.40
codegen_flags: <defaults>
</compile_context>

<pallas_src>
import functools

import jax
import jax.numpy as jnp
from jax.experimental import pallas as pl
from jax.experimental.pallas import tpu as pltpu

HIDDEN = 24
LANE = 128  # TPU lane width; hidden/output feature dims are zero-padded to this in the slab.


def _round_up(x, m):
    return (x + m - 1) // m * m


def _cdiv(a, b):
    return -(-a // b)


def dqn_mlp_kernel(x_ref, p_ref, o_ref, *, in_pad, out_size, compute_dtype):
    # Packed parameter slab layout (rows x 128 lanes, f32, zero padded):
    #   [0,            in_pad)       W1   valid block [:input_size, :24]
    #   [in_pad,       in_pad+128)   W2   valid block [:24, :24]
    #   [in_pad+128,   in_pad+256)   W3   valid block [:24, :out]
    #   row in_pad+256               b1   lanes [:24]
    #   row in_pad+264               b2   lanes [:24]
    #   row in_pad+272               b3   lanes [:out]
    # Zero padding keeps padded hidden lanes exactly 0 through ReLU, so the
    # math matches the unpadded reference.  All slice offsets are 8-aligned.
    w1 = p_ref[0:in_pad, :].astype(compute_dtype)
    w2 = p_ref[in_pad:in_pad + LANE, :].astype(compute_dtype)
    w3 = p_ref[in_pad + LANE:in_pad + 2 * LANE, :].astype(compute_dtype)
    boff = in_pad + 2 * LANE
    b1 = p_ref[boff + 0:boff + 1, :]
    b2 = p_ref[boff + 8:boff + 9, :]
    b3 = p_ref[boff + 16:boff + 17, :]

    x = x_ref[...].astype(compute_dtype)  # (blk, in_pad)
    h1 = jnp.maximum(jnp.dot(x, w1, preferred_element_type=jnp.float32) + b1, 0.0)
    h2 = jnp.maximum(
        jnp.dot(h1.astype(compute_dtype), w2, preferred_element_type=jnp.float32) + b2, 0.0)
    q = jnp.dot(h2.astype(compute_dtype), w3, preferred_element_type=jnp.float32) + b3
    # Narrow store: only the real Q-value columns hit HBM.
    o_ref[...] = q[:, :out_size].astype(o_ref.dtype)


def pack_params(params, input_size, output_size):
    """Pack (w1,b1,w2,b2,w3,b3) into one zero-padded (rows, 128) f32 slab."""
    w1, b1, w2, b2, w3, b3 = params  # weights stored as (in, out); biases (out,)
    in_pad = _round_up(input_size, 8)
    rows = in_pad + 2 * LANE + 24
    slab = jnp.zeros((rows, LANE), jnp.float32)
    slab = slab.at[:input_size, :HIDDEN].set(w1)
    slab = slab.at[in_pad:in_pad + HIDDEN, :HIDDEN].set(w2)
    slab = slab.at[in_pad + LANE:in_pad + LANE + HIDDEN, :output_size].set(w3)
    slab = slab.at[in_pad + 2 * LANE + 0, :HIDDEN].set(b1.reshape(-1))
    slab = slab.at[in_pad + 2 * LANE + 8, :HIDDEN].set(b2.reshape(-1))
    slab = slab.at[in_pad + 2 * LANE + 16, :output_size].set(b3.reshape(-1))
    return slab


def drone_dqn_forward(x, packed_params, *, input_size, output_size,
                      block_batch=2048, compute_dtype=jnp.float32):
    """Forward pass. x: (batch, input_size) float -> (batch, output_size) f32."""
    batch = x.shape[0]
    in_pad = _round_up(input_size, 8)

    # Balanced blocking: as few blocks as possible (amortize ~0.35us/step grid
    # overhead) but keep >= 2 blocks for large batches so both v7x TCs work.
    nblk = _cdiv(batch, block_batch)
    if nblk < 2 and batch >= 256:
        nblk = 2
    blk = _round_up(_cdiv(batch, nblk), 8)   # multiple of 8 (f32 sublanes)
    batch_pad = nblk * blk

    # Pad only when actually needed (common case: no copy at all).
    pad_b = batch_pad - batch
    pad_f = in_pad - input_size
    x_in = x
    if pad_b or pad_f:
        x_in = jnp.pad(x_in, ((0, pad_b), (0, pad_f)))

    p_rows = packed_params.shape[0]
    kernel = functools.partial(dqn_mlp_kernel, in_pad=in_pad,
                               out_size=output_size, compute_dtype=compute_dtype)

    flops = 2 * batch * (input_size * HIDDEN + HIDDEN * HIDDEN + HIDDEN * output_size)
    bytes_accessed = int(x_in.nbytes) + int(packed_params.nbytes) + batch_pad * output_size * 4

    out = pl.pallas_call(
        kernel,
        out_shape=jax.ShapeDtypeStruct((batch_pad, output_size), jnp.float32),
        grid=(nblk,),
        in_specs=[
            # x: tiled along batch only.
            pl.BlockSpec((blk, in_pad), lambda i: (i, 0)),
            # packed params: constant block index -> DMA'd once, VMEM-resident.
            pl.BlockSpec((p_rows, LANE), lambda i: (0, 0)),
        ],
        out_specs=pl.BlockSpec((blk, output_size), lambda i: (i, 0)),
        compiler_params=pltpu.CompilerParams(
            dimension_semantics=("parallel",),  # batch axis -> both TCs on v7x
        ),
        cost_estimate=pl.CostEstimate(flops=flops, transcendentals=0,
                                      bytes_accessed=bytes_accessed),
    )(x_in, packed_params)

    if batch_pad != batch:
        out = out[:batch]
    return out


def init_params(key, input_size, output_size, hidden=HIDDEN):
    """PyTorch-style uniform(-1/sqrt(fan_in), 1/sqrt(fan_in)) init.

    Weights are stored as (in, out), i.e. already transposed relative to
    nn.Linear's (out, in), so forward is x @ W + b.
    """
    ks = jax.random.split(key, 6)

    def lin(kw, kb, fan_in, fan_out):
        bound = 1.0 / jnp.sqrt(jnp.float32(fan_in))
        w = jax.random.uniform(kw, (fan_in, fan_out), jnp.float32, -bound, bound)
        b = jax.random.uniform(kb, (fan_out,), jnp.float32, -bound, bound)
        return w, b

    w1, b1 = lin(ks[0], ks[1], input_size, hidden)
    w2, b2 = lin(ks[2], ks[3], hidden, hidden)
    w3, b3 = lin(ks[4], ks[5], hidden, output_size)
    return (w1, b1, w2, b2, w3, b3)


def reference_forward(x, params):
    w1, b1, w2, b2, w3, b3 = params
    h1 = jnp.maximum(x @ w1 + b1, 0.0)
    h2 = jnp.maximum(h1 @ w2 + b2, 0.0)
    return h2 @ w3 + b3


if __name__ == "__main__":
    key = jax.random.PRNGKey(0)
    k_x, k_p = jax.random.split(key)

    batch, input_size, output_size = 8, 16, 4
    x = jax.random.normal(k_x, (batch, input_size), jnp.float32)
    params = init_params(k_p, input_size, output_size)
    packed = pack_params(params, input_size, output_size)

    ref = reference_forward(x, params)

    # Default f32 path: matches the nn.Linear reference to fp tolerance.
    out = drone_dqn_forward(x, packed, input_size=input_size,
                            output_size=output_size)
    out = jax.block_until_ready(out)
    assert out.shape == (batch, output_size)
    assert jnp.allclose(out, ref, atol=1e-5, rtol=1e-5)

    # bf16-MXU perf option (weights/x cast in-kernel, f32 accumulation):
    # looser tolerance per bf16 mantissa, padded lanes stay exactly 0.
    out_bf16 = drone_dqn_forward(x, packed, input_size=input_size,
                                 output_size=output_size,
                                 compute_dtype=jnp.bfloat16)
    out_bf16 = jax.block_until_ready(out_bf16)
    assert out_bf16.shape == (batch, output_size)
    assert jnp.allclose(out_bf16, ref, atol=5e-2, rtol=5e-2)

    print("KERNEL_OK")
</pallas_src>

<mosaic_0001>
module attributes {stable_mosaic.version = 11 : i64} {
  func.func @dqn_mlp_kernel(%arg0: i32, %arg1: memref<8x16xf32, #tpu.memory_space<vmem>>, %arg2: memref<296x128xf32, #tpu.memory_space<vmem>>, %arg3: memref<8x4xf32, #tpu.memory_space<vmem>>) attributes {dimension_semantics = [#tpu.dimension_semantics<parallel>], iteration_bounds = array<i64: 1>, scalar_prefetch = 0 : i64, scratch_operands = 0 : i64, tpu.core_type = #tpu.core_type<tc>, window_params = [{transform_indices = @transform_0, window_bounds = array<i64: 8, 16>}, {pipeline_mode = #tpu.pipeline_mode<synchronous>, transform_indices = @transform_1, window_bounds = array<i64: 296, 128>}, {transform_indices = @transform_2, window_bounds = array<i64: 8, 4>}]} {
    %c0 = arith.constant 0 : index
    %c0_0 = arith.constant 0 : index
    %0 = vector.load %arg2[%c0, %c0_0] : memref<296x128xf32, #tpu.memory_space<vmem>>, vector<16x128xf32>
    %c16 = arith.constant 16 : index
    %c0_1 = arith.constant 0 : index
    %1 = vector.load %arg2[%c16, %c0_1] : memref<296x128xf32, #tpu.memory_space<vmem>>, vector<128x128xf32>
    %c144 = arith.constant 144 : index
    %c0_2 = arith.constant 0 : index
    %2 = vector.load %arg2[%c144, %c0_2] : memref<296x128xf32, #tpu.memory_space<vmem>>, vector<128x128xf32>
    %c272 = arith.constant 272 : index
    %c0_3 = arith.constant 0 : index
    %3 = vector.load %arg2[%c272, %c0_3] : memref<296x128xf32, #tpu.memory_space<vmem>>, vector<1x128xf32>
    %c280 = arith.constant 280 : index
    %c0_4 = arith.constant 0 : index
    %4 = vector.load %arg2[%c280, %c0_4] : memref<296x128xf32, #tpu.memory_space<vmem>>, vector<1x128xf32>
    %c288 = arith.constant 288 : index
    %c0_5 = arith.constant 0 : index
    %5 = vector.load %arg2[%c288, %c0_5] : memref<296x128xf32, #tpu.memory_space<vmem>>, vector<1x128xf32>
    %c0_6 = arith.constant 0 : index
    %c0_7 = arith.constant 0 : index
    %6 = vector.load %arg1[%c0_6, %c0_7] : memref<8x16xf32, #tpu.memory_space<vmem>>, vector<8x16xf32>
    %cst = arith.constant dense<0.000000e+00> : vector<8x128xf32>
    %7 = tpu.matmul %6, %0, %cst {dimension_numbers = #tpu.dot_dimension_numbers<[1], [0], [0], [1], [0, 0, 1, 1], [], []>} : vector<8x16xf32>, vector<16x128xf32>, vector<8x128xf32> -> vector<8x128xf32>
    %8 = vector.broadcast %3 : vector<1x128xf32> to vector<8x128xf32>
    %9 = arith.addf %7, %8 : vector<8x128xf32>
    %cst_8 = arith.constant 0.000000e+00 : f32
    %10 = vector.broadcast %cst_8 : f32 to vector<8x128xf32>
    %11 = arith.maximumf %9, %10 : vector<8x128xf32>
    %cst_9 = arith.constant dense<0.000000e+00> : vector<8x128xf32>
    %12 = tpu.matmul %11, %1, %cst_9 {dimension_numbers = #tpu.dot_dimension_numbers<[1], [0], [0], [1], [0, 0, 1, 1], [], []>} : vector<8x128xf32>, vector<128x128xf32>, vector<8x128xf32> -> vector<8x128xf32>
    %13 = vector.broadcast %4 : vector<1x128xf32> to vector<8x128xf32>
    %14 = arith.addf %12, %13 : vector<8x128xf32>
    %cst_10 = arith.constant 0.000000e+00 : f32
    %15 = vector.broadcast %cst_10 : f32 to vector<8x128xf32>
    %16 = arith.maximumf %14, %15 : vector<8x128xf32>
    %cst_11 = arith.constant dense<0.000000e+00> : vector<8x128xf32>
    %17 = tpu.matmul %16, %2, %cst_11 {dimension_numbers = #tpu.dot_dimension_numbers<[1], [0], [0], [1], [0, 0, 1, 1], [], []>} : vector<8x128xf32>, vector<128x128xf32>, vector<8x128xf32> -> vector<8x128xf32>
    %18 = vector.broadcast %5 : vector<1x128xf32> to vector<8x128xf32>
    %19 = arith.addf %17, %18 : vector<8x128xf32>
    %20 = vector.extract_strided_slice %19 {offsets = [0, 0], sizes = [8, 4], strides = [1, 1]} : vector<8x128xf32> to vector<8x4xf32>
    %c0_12 = arith.constant 0 : index
    %c0_13 = arith.constant 0 : index
    %21 = vector.load %arg3[%c0_12, %c0_13] : memref<8x4xf32, #tpu.memory_space<vmem>>, vector<8x4xf32>
    tpu.vector_store %arg3[%c0_12, %c0_13], %20 {strides = array<i32>} : memref<8x4xf32, #tpu.memory_space<vmem>>, vector<8x4xf32>,
    return
  }
  func.func @transform_0(%arg0: i32) -> (i32, i32) {
    %c0_i32 = arith.constant 0 : i32
    %c0_i32_0 = arith.constant 0 : i32
    return %arg0, %c0_i32 : i32, i32
  }
  func.func @transform_1(%arg0: i32) -> (i32, i32) {
    %c0_i32 = arith.constant 0 : i32
    %c0_i32_0 = arith.constant 0 : i32
    %c0_i32_1 = arith.constant 0 : i32
    return %c0_i32, %c0_i32_0 : i32, i32
  }
  func.func @transform_2(%arg0: i32) -> (i32, i32) {
    %c0_i32 = arith.constant 0 : i32
    %c0_i32_0 = arith.constant 0 : i32
    return %arg0, %c0_i32 : i32, i32
  }
}

</mosaic_0001>

<bundles_post_ra>
// kernel: tpu_custom_call.1
= control target key start
LH: loop header
LB: loop body
LE: loop exit
PB: predicated region body
PF: predicated region fallthrough
CT: control target
= control target key end

     0   :  { %7 = vsyncpa [#allocation3], 0  ;;  %s611_s0 = inlined_call_operand.hbm [shape: f32[8,16], index: 0, kind: input, shape index: {}]   ;;  %s612_s1 = inlined_call_operand.hbm [shape: f32[296,128], index: 1, kind: input, shape index: {}]   ;;  %s613_s2 = inlined_call_operand.vmem [shape: f32[8,4], index: 2, kind: output, shape index: {}]  }
   0x1   :  { %8 = vsyncpa [#allocation5], 0  ;;  %s535_s9 = smov [#allocation2]   ;;  %s536_s11 = smov [#allocation4]  }
   0x2   :  { %s15_s10 = sshll.u32 %s535_s9, 4  ;;  %s24_s12 = sshll.u32 %s536_s11, 4  ;;  %s16_s10 = int_to_ptr.vmem [resolvable:$true] %s15_s10  ;;  %s557_s12 = int_to_ptr.vmem [resolvable:$true] %s24_s12 }
   0x3   :  { %s487_s15 = scalar_lea.hbm %s611_s0, 128 }
   0x4   :  { %p488_p0 = scmp.ne.s32.totalorder %s611_s0, %s487_s15  ;;  %p491_p1 = scmp.lt.u32.totalorder %s487_s15, %s611_s0 }
   0x6   :  { %p493_p2 = pnand %p491_p1, %p488_p0 }
   0x8   :  { %496 = shalt.err (!%p493_p2)
}
   0x9   :  { %s497_s20 = scalar_lea.vmem %s16_s10, 128  ;;  %p502_p4 = scmp.lt.s32.totalorder %s16_s10, %s16_s10 }
   0xa   :  { %p498_p3 = scmp.ne.s32.totalorder %s16_s10, %s497_s20  ;;  %p503_p5 = scmp.lt.s32.totalorder %s497_s20, %s497_s20 }
   0xc   :  { %p504_p6 = por %p503_p5, %p502_p4 }
   0xe   :  { %p505_p7 = pnand %p504_p6, %p498_p3 }
  0x10   :  { %508 = shalt.err (!%p505_p7)
}
  0x11   :  { %18 = dma.hbm_to_vmem [thread:$0]  %s611_s0, 128, %s16_s10, [#allocation3]  }
  0x12   :  { %s509_s25 = scalar_lea.hbm %s612_s1, 4736 }
  0x13   :  { %p510_p8 = scmp.ne.s32.totalorder %s612_s1, %s509_s25  ;;  %p513_p9 = scmp.lt.u32.totalorder %s509_s25, %s612_s1 }
  0x15   :  { %p515_p10 = pnand %p513_p9, %p510_p8 }
  0x17   :  { %518 = shalt.err (!%p515_p10)
}
  0x18   :  { %s519_s30 = scalar_lea.vmem %s557_s12, 4736  ;;  %p524_p12 = scmp.lt.s32.totalorder %s557_s12, %s557_s12 }
  0x19   :  { %p520_p11 = scmp.ne.s32.totalorder %s557_s12, %s519_s30  ;;  %p525_p13 = scmp.lt.s32.totalorder %s519_s30, %s519_s30 }
  0x1b   :  { %p526_p0 = por %p525_p13, %p524_p12 }
  0x1d   :  { %p527_p1 = pnand %p526_p0, %p520_p11 }
  0x1f   :  { %530 = shalt.err (!%p527_p1)
}
  0x20   :  { %s537_s0 = smov 128   ;;  %s538_s3 = smov 8  }
  0x21   :  { %30 = dma.hbm_to_vmem [thread:$0]  %s612_s1, 4736, %s557_s12, [#allocation5], %s537_s0, %s537_s0, %s538_s3  }
  0x22   :  { %531 = dma.done.wait [#allocation3], 128  }
  0x23   :  { %532 = vsyncadd [#allocation3], 4294967168 }
  0x24   :  { %533 = dma.done.wait [#allocation5], 4736  }
  0x25   :  { %534 = vsyncadd [#allocation5], 4294962560  ;;  %v539_v0 = vmov 0.0|0.0   ;;  %vm540_vm0 = vmmov 0   ;;  %v541_v1 = vmov 0.0   ;;  %v37_v2 = vld [vmem:[#allocation4] sm:$0xff] }
  0x26   :  { %429 = vmatprep.subr.bf16.mxu0 %v539_v0  ;;  %356 = vmatprep.mubr.msk.f32.mxu0 %vm540_vm0, %v541_v1  ;;  %v38_v3 = vld [vmem:[#allocation4 + $0x8] sm:$0xff]  ;;  %v39_v5 = vld [vmem:[#allocation4 + $0x10] sm:$0xff]  ;;  %v40_v6 = vld [vmem:[#allocation4 + $0x18] sm:$0xff]  ;;  %vm79_vm1 = vcmask 130048   ;;  %vm303_vm2 = vcmask 31744  }
  0x27   :  { %432 = vmatprep.subr.bf16.mxu1 %v539_v0  ;;  %391 = vmatprep.mubr.msk.f32.mxu1 %vm540_vm0, %v541_v1  ;;  %v430_v4 = vpack.c.bf16 %v38_v3, %v37_v2  ;;  %v41_v7 = vld [vmem:[#allocation4 + $0x20] sm:$0xff]  ;;  %v433_v8 = vpack.c.bf16 %v40_v6, %v39_v5  ;;  %v42_v9 = vld [vmem:[#allocation4 + $0x28] sm:$0xff]  ;;  %v74_v10 = vld [vmem:[#allocation2] sm:$0xff] }
  0x28   :  { %v436_v11 = vpack.c.bf16 %v42_v9, %v41_v7  ;;  %v43_v12 = vld [vmem:[#allocation4 + $0x30] sm:$0xff]  ;;  %v44_v13 = vld [vmem:[#allocation4 + $0x38] sm:$0xff]  ;;  %v45_v15 = vld [vmem:[#allocation4 + $0x40] sm:$0xff] }
  0x29   :  { %431 = vmatpush3.bf16.msra.mxu0 %v430_v4  ;;  %434 = vmatpush3.bf16.msra.mxu1 %v433_v8  ;;  %v439_v14 = vpack.c.bf16 %v44_v13, %v43_v12  ;;  %v46_v16 = vld [vmem:[#allocation4 + $0x48] sm:$0xff]  ;;  %v47_v18 = vld [vmem:[#allocation4 + $0x50] sm:$0xff]  ;;  %v48_v19 = vld [vmem:[#allocation4 + $0x58] sm:$0xff] }
  0x2a   :  { %456 = vmatprep.subr.bf16.mxu0 %v539_v0  ;;  %435 = vmatprep.subr.bf16.mxu1 %v539_v0  ;;  %v442_v17 = vpack.c.bf16 %v46_v16, %v45_v15  ;;  %v445_v20 = vpack.c.bf16 %v48_v19, %v47_v18  ;;  %v49_v21 = vld [vmem:[#allocation4 + $0x60] sm:$0xff]  ;;  %v50_v22 = vld [vmem:[#allocation4 + $0x68] sm:$0xff]  ;;  %v51_v24 = vld [vmem:[#allocation4 + $0x70] sm:$0xff] }
  0x2b   :  { %v448_v23 = vpack.c.bf16 %v50_v22, %v49_v21  ;;  %v52_v25 = vld [vmem:[#allocation4 + $0x78] sm:$0xff]  ;;  %v53_v27 = vld [vmem:[#allocation4 + $0x80] sm:$0xff]  ;;  %v54_v28 = vld [vmem:[#allocation4 + $0x88] sm:$0xff] }
  0x2c   :  { %357 = vmatmul.mubr.msk.f32.vlgmr.msra.gmra.mrb[0].mxu0 %vm79_vm1, %v74_v10  ;;  %v451_v26 = vpack.c.bf16 %v52_v25, %v51_v24  ;;  %v454_v29 = vpack.c.bf16 %v54_v28, %v53_v27  ;;  %v55_v30 = vld [vmem:[#allocation4 + $0x90] sm:$0xff]  ;;  %v56_v31 = vld [vmem:[#allocation4 + $0x98] sm:$0xff]  ;;  %v57_v32 = vld [vmem:[#allocation4 + $0xa0] sm:$0xff] }
  0x2d   :  { %426 = vmatprep.mubr.msk.f32.mxu0 %vm540_vm0, %v541_v1  ;;  %437 = vmatpush3.bf16.msra.mxu1 %v436_v11  ;;  %v457_v33 = vpack.c.bf16 %v56_v31, %v55_v30  ;;  %v58_v34 = vld [vmem:[#allocation4 + $0xa8] sm:$0xff]  ;;  %v59_v36 = vld [vmem:[#allocation4 + $0xb0] sm:$0xff]  ;;  %v60_v37 = vld [vmem:[#allocation4 + $0xb8] sm:$0xff] }
  0x2e   :  { %438 = vmatprep.subr.bf16.mxu1 %v539_v0  ;;  %v460_v35 = vpack.c.bf16 %v58_v34, %v57_v32  ;;  %v463_v38 = vpack.c.bf16 %v60_v37, %v59_v36  ;;  %v61_v39 = vld [vmem:[#allocation4 + $0xc0] sm:$0xff]  ;;  %v62_v40 = vld [vmem:[#allocation4 + $0xc8] sm:$0xff]  ;;  %v63_v42 = vld [vmem:[#allocation4 + $0xd0] sm:$0xff] }
  0x2f   :  { %458 = vmatpush3.bf16.msra.mxu0 %v457_v33  ;;  %v466_v41 = vpack.c.bf16 %v62_v40, %v61_v39  ;;  %v64_v43 = vld [vmem:[#allocation4 + $0xd8] sm:$0xff]  ;;  %v65_v45 = vld [vmem:[#allocation4 + $0xe0] sm:$0xff]  ;;  %v66_v46 = vld [vmem:[#allocation4 + $0xe8] sm:$0xff] }
  0x30   :  { %459 = vmatprep.subr.bf16.mxu0 %v539_v0  ;;  %v469_v44 = vpack.c.bf16 %v64_v43, %v63_v42  ;;  %v472_v47 = vpack.c.bf16 %v66_v46, %v65_v45  ;;  %v67_v48 = vld [vmem:[#allocation4 + $0xf0] sm:$0xff]  ;;  %v68_v49 = vld [vmem:[#allocation4 + $0xf8] sm:$0xff]  ;;  %v69_v56 = vld [vmem:[#allocation4 + $0x100] sm:$0xff] }
  0x31   :  { %440 = vmatpush3.bf16.msra.mxu1 %v439_v14  ;;  %v475_v50 = vpack.c.bf16 %v68_v49, %v67_v48  ;;  %v311_v51 = vld [vmem:[#allocation4 + $0x110] ss:$0 sm:$0xff]  ;;  %v70_v57 = vld [vmem:[#allocation4 + $0x108] sm:$0xff]  ;;  %v313_v59 = vld [vmem:[#allocation4 + $0x118] ss:$0 sm:$0xff] }
  0x32   :  { %441 = vmatprep.subr.bf16.mxu1 %v539_v0  ;;  %v478_v58 = vpack.c.bf16 %v70_v57, %v69_v56  ;;  %v314_v1 = vld [vmem:[#allocation4 + $0x120] ss:$0 sm:$0xff] }
  0x33   :  { %461 = vmatpush3.bf16.msra.mxu0 %v460_v35 }
  0x34   :  { %462 = vmatprep.subr.bf16.mxu0 %v539_v0 }
  0x35   :  { %443 = vmatpush3.bf16.msra.mxu1 %v442_v17 }
  0x36   :  { %444 = vmatprep.subr.bf16.mxu1 %v539_v0 }
  0x37   :  { %464 = vmatpush3.bf16.msra.mxu0 %v463_v38 }
  0x38   :  { %465 = vmatprep.subr.bf16.mxu0 %v539_v0 }
  0x39   :  { %446 = vmatpush3.bf16.msra.mxu1 %v445_v20 }
  0x3a   :  { %447 = vmatprep.subr.bf16.mxu1 %v539_v0 }
  0x3b   :  { %467 = vmatpush3.bf16.msra.mxu0 %v466_v41 }
  0x3c   :  { %468 = vmatprep.subr.bf16.mxu0 %v539_v0 }
  0x3d   :  { %449 = vmatpush3.bf16.msra.mxu1 %v448_v23 }
  0x3e   :  { %450 = vmatprep.subr.bf16.mxu1 %v539_v0 }
  0x3f   :  { %470 = vmatpush3.bf16.msra.mxu0 %v469_v44 }
  0x40   :  { %471 = vmatprep.subr.bf16.mxu0 %v539_v0 }
  0x41   :  { %452 = vmatpush3.bf16.msra.mxu1 %v451_v26 }
  0x42   :  { %453 = vmatprep.subr.bf16.mxu1 %v539_v0 }
  0x43   :  { %473 = vmatpush3.bf16.msra.mxu0 %v472_v47 }
  0x44   :  { %474 = vmatprep.subr.bf16.mxu0 %v539_v0 }
  0x45   :  { %455 = vmatpush3.bf16.msra.mxu1 %v454_v29 }
  0x47   :  { %476 = vmatpush3.bf16.msra.mxu0 %v475_v50 }
  0x48   :  { %477 = vmatprep.subr.bf16.mxu0 %v539_v0 }
  0x4b   :  { %479 = vmatpush3.bf16.msra.mxu0 %v478_v58 }
  0xff   :  { %v149_v52 = vpop.f32.mrb[0].mxu0 }
 0x100   :  { %v150_v53 = vadd.f32 %v311_v51, %v149_v52  ;;  %v358_v54 = vpop.f32.mrb[1].mxu0 }
 0x102   :  { %v153_v55 = vmax.f32 %v150_v53, 0.0 }
 0x104   :  { %392 = vmatmul.mubr.f32.vlgmr.msra.gmra.mrb[0].mxu1 %v153_v55 }
 0x1d7   :  { %v224_v60 = vpop.f32.mrb[0].mxu1 }
 0x1d8   :  { %v225_v61 = vadd.f32 %v313_v59, %v224_v60  ;;  %v393_v62 = vpop.f32.mrb[1].mxu1 }
 0x1da   :  { %v228_v63 = vmax.f32 %v225_v61, 0.0 }
 0x1dc   :  { %427 = vmatmul.mubr.f32.vlgmr.msra.gmra.mrb[2].mxu0 %v228_v63 }
 0x2af   :  { %v299_v2 = vpop.f32.mrb[2].mxu0 }
 0x2b0   :  { %v300_v0 = vadd.f32 %v314_v1, %v299_v2  ;;  %v428_v3 = vpop.f32.mrb[3].mxu0 }
 0x2b2   :  { %304 = vst.msk [vmem:[%s613_s2] sm:$0xff] %vm303_vm2, %v300_v0 }
 0x2b3   :  { %309 = vsyncpa [#allocation3], 1 }
 0x2b4   :  { %310 = vsyncpa [#allocation5], 1 }

</bundles_post_ra>
